<compile_context>
chip_gen: v7x
topology: tpu7x:2x2x1
jax: 0.10.0
libtpu: 0.0.40
codegen_flags: <defaults>
</compile_context>

<pallas_src>
import math
import functools

import jax
import jax.numpy as jnp
import numpy as np
from jax.experimental import pallas as pl
from jax.experimental.pallas import tpu as pltpu


_SQRT1_2 = 0.7071067811865476


def _erf(x):
    # Exact-GELU needs erf; implemented with the Abramowitz & Stegun 7.1.26
    # rational approximation (|abs error| < 1.5e-7) using only ops with
    # guaranteed Mosaic lowerings (exp / mul / add / where).
    a1, a2, a3, a4, a5 = (0.254829592, -0.284496736, 1.421413741,
                          -1.453152027, 1.061405429)
    p = 0.3275911
    ax = jnp.abs(x)
    t = 1.0 / (1.0 + p * ax)
    poly = ((((a5 * t + a4) * t + a3) * t + a2) * t + a1) * t
    y = 1.0 - poly * jnp.exp(-ax * ax)
    return jnp.where(x >= 0, y, -y)


def _gelu_exact(x):
    # HF ACT2FN["gelu"] == torch.nn.functional.gelu (erf form).
    return 0.5 * x * (1.0 + _erf(x * _SQRT1_2))


def _mlm_head_kernel(x_ref, wd_ref, bd_ref, g_ref, beta_ref, wdec_ref, bdec_ref,
                     out_ref, h_ref, *, eps):
    # x_ref    : (tm, H)   token tile of sequence_output
    # wd_ref   : (H, H)    transform dense weight  (in -> out)
    # bd_ref   : (1, H)    transform dense bias
    # g_ref    : (1, H)    LayerNorm gamma
    # beta_ref : (1, H)    LayerNorm beta
    # wdec_ref : (H, tv)   decoder weight vocab slice (in -> out)
    # bdec_ref : (1, tv)   decoder (tied) bias vocab slice
    # out_ref  : (tm, tv)  logits tile
    # h_ref    : (tm, H)   f32 scratch holding the transformed token tile
    j = pl.program_id(1)

    @pl.when(j == 0)
    def _():
        x = x_ref[...]
        h = jnp.dot(x, wd_ref[...], preferred_element_type=jnp.float32)
        h = h + bd_ref[...]
        h = _gelu_exact(h)
        mu = jnp.mean(h, axis=-1, keepdims=True)
        var = jnp.mean(jnp.square(h - mu), axis=-1, keepdims=True)
        h = (h - mu) * jax.lax.rsqrt(var + eps)
        h = h * g_ref[...] + beta_ref[...]
        h_ref[...] = h

    logits = jnp.dot(h_ref[...].astype(wdec_ref.dtype), wdec_ref[...],
                     preferred_element_type=jnp.float32)
    out_ref[...] = (logits + bdec_ref[...]).astype(out_ref.dtype)


def prepare_mlm_head_params(torch_params):
    """Repack torch-layout parameters ONCE (outside the per-call hot path)."""
    return {
        "dense_w": jnp.asarray(torch_params["dense_w"]).T,           # (H, H) in->out
        "dense_b": jnp.asarray(torch_params["dense_b"]).reshape(1, -1),
        "ln_gamma": jnp.asarray(torch_params["ln_gamma"]).reshape(1, -1),
        "ln_beta": jnp.asarray(torch_params["ln_beta"]).reshape(1, -1),
        "dec_w": jnp.asarray(torch_params["dec_w"]).T,               # (H, V) in->out
        "dec_b": jnp.asarray(torch_params["dec_b"]).reshape(1, -1),
    }


def _pick_tile(n, candidates):
    for c in candidates:
        if n % c == 0:
            return c
    return n


def blip_text_mlm_head(sequence_output, packed_params, *, eps=1e-12,
                       tm=None, tv=None):
    """BlipTextOnlyMLMHead.forward: Linear(H,H) -> GELU -> LayerNorm -> Linear(H,V)+bias.

    sequence_output: [B, S, H].  Returns prediction_scores [B, S, V].
    """
    B, S, H = sequence_output.shape
    V = packed_params["dec_w"].shape[1]
    M = B * S
    x = sequence_output.reshape(M, H)

    tm = tm or _pick_tile(M, (256, 128, 64, 32, 16, 8))
    tv = tv or _pick_tile(V, (512, 384, 256, 128))
    assert M % tm == 0 and V % tv == 0
    assert (tm % 8 == 0) or (tm == M)
    assert (tv % 128 == 0) or (tv == V)

    kernel = functools.partial(_mlm_head_kernel, eps=eps)

    grid_spec = pltpu.PrefetchScalarGridSpec(
        num_scalar_prefetch=0,
        grid=(M // tm, V // tv),
        in_specs=[
            pl.BlockSpec((tm, H), lambda i, j: (i, 0)),   # x token tile
            pl.BlockSpec((H, H), lambda i, j: (0, 0)),    # dense W (resident)
            pl.BlockSpec((1, H), lambda i, j: (0, 0)),    # dense b (resident)
            pl.BlockSpec((1, H), lambda i, j: (0, 0)),    # LN gamma (resident)
            pl.BlockSpec((1, H), lambda i, j: (0, 0)),    # LN beta (resident)
            pl.BlockSpec((H, tv), lambda i, j: (0, j)),   # decoder W vocab slice
            pl.BlockSpec((1, tv), lambda i, j: (0, j)),   # decoder bias slice
        ],
        out_specs=pl.BlockSpec((tm, tv), lambda i, j: (i, j)),
        scratch_shapes=[pltpu.VMEM((tm, H), jnp.float32)],
    )

    out = pl.pallas_call(
        kernel,
        out_shape=jax.ShapeDtypeStruct((M, V), sequence_output.dtype),
        grid_spec=grid_spec,
        compiler_params=pltpu.CompilerParams(
            dimension_semantics=("parallel", "arbitrary")),
    )(x, packed_params["dense_w"], packed_params["dense_b"],
      packed_params["ln_gamma"], packed_params["ln_beta"],
      packed_params["dec_w"], packed_params["dec_b"])

    return out.reshape(B, S, V)


def _reference(sequence_output, torch_params, eps):
    hp = jax.lax.Precision.HIGHEST
    h = jnp.dot(sequence_output, torch_params["dense_w"].T, precision=hp)
    h = h + torch_params["dense_b"]
    h = jax.nn.gelu(h, approximate=False)                 # exact (erf) GELU
    mu = jnp.mean(h, axis=-1, keepdims=True)
    var = jnp.mean(jnp.square(h - mu), axis=-1, keepdims=True)
    h = (h - mu) / jnp.sqrt(var + eps)
    h = h * torch_params["ln_gamma"] + torch_params["ln_beta"]
    logits = jnp.dot(h, torch_params["dec_w"].T, precision=hp)
    return logits + torch_params["dec_b"]


if __name__ == "__main__":
    B, S, H, V = 2, 8, 32, 384   # small shapes; V multiple of 128 for lane-dense tiles
    eps = 1e-12

    key = jax.random.PRNGKey(0)
    ks = jax.random.split(key, 8)
    bound = 1.0 / math.sqrt(H)

    torch_params = {
        "dense_w": jax.random.uniform(ks[0], (H, H), jnp.float32, -bound, bound),
        "dense_b": jax.random.uniform(ks[1], (H,), jnp.float32, -bound, bound),
        "ln_gamma": 1.0 + 0.1 * jax.random.normal(ks[2], (H,), jnp.float32),
        "ln_beta": 0.1 * jax.random.normal(ks[3], (H,), jnp.float32),
        "dec_w": jax.random.uniform(ks[4], (V, H), jnp.float32, -bound, bound),
        "dec_b": jax.random.uniform(ks[5], (V,), jnp.float32, -bound, bound),
    }
    sequence_output = jax.random.normal(ks[6], (B, S, H), jnp.float32)

    packed = prepare_mlm_head_params(torch_params)

    # tm=8, tv=128 -> grid (2, 3): exercises both the multi-token-tile path and
    # the cached-transform reuse across vocab tiles.
    logits = blip_text_mlm_head(sequence_output, packed, eps=eps, tm=8, tv=128)
    jax.block_until_ready(logits)

    ref = _reference(sequence_output, torch_params, eps)
    np.testing.assert_allclose(np.asarray(logits), np.asarray(ref),
                               rtol=2e-5, atol=2e-5)

    print("KERNEL_OK")
</pallas_src>

<mosaic_0001>
module attributes {stable_mosaic.version = 11 : i64} {
  func.func @_mlm_head_kernel(%arg0: i32, %arg1: i32, %arg2: memref<8x32xf32, #tpu.memory_space<vmem>>, %arg3: memref<32x32xf32, #tpu.memory_space<vmem>>, %arg4: memref<1x32xf32, #tpu.memory_space<vmem>>, %arg5: memref<1x32xf32, #tpu.memory_space<vmem>>, %arg6: memref<1x32xf32, #tpu.memory_space<vmem>>, %arg7: memref<32x128xf32, #tpu.memory_space<vmem>>, %arg8: memref<1x128xf32, #tpu.memory_space<vmem>>, %arg9: memref<8x128xf32, #tpu.memory_space<vmem>>, %arg10: memref<8x32xf32, #tpu.memory_space<vmem>>) attributes {dimension_semantics = [#tpu.dimension_semantics<parallel>, #tpu.dimension_semantics<arbitrary>], iteration_bounds = array<i64: 2, 3>, scalar_prefetch = 0 : i64, scratch_operands = 1 : i64, tpu.core_type = #tpu.core_type<tc>, window_params = [{transform_indices = @transform_0, window_bounds = array<i64: 8, 32>}, {pipeline_mode = #tpu.pipeline_mode<synchronous>, transform_indices = @transform_1, window_bounds = array<i64: 32, 32>}, {pipeline_mode = #tpu.pipeline_mode<synchronous>, transform_indices = @transform_2, window_bounds = array<i64: 1, 32>}, {pipeline_mode = #tpu.pipeline_mode<synchronous>, transform_indices = @transform_3, window_bounds = array<i64: 1, 32>}, {pipeline_mode = #tpu.pipeline_mode<synchronous>, transform_indices = @transform_4, window_bounds = array<i64: 1, 32>}, {transform_indices = @transform_5, window_bounds = array<i64: 32, 128>}, {transform_indices = @transform_6, window_bounds = array<i64: 1, 128>}, {transform_indices = @transform_7, window_bounds = array<i64: 8, 128>}]} {
    %c0_i32 = arith.constant 0 : i32
    %0 = arith.cmpi eq, %arg1, %c0_i32 : i32
    %1 = arith.extui %0 : i1 to i32
    %c0_i32_0 = arith.constant 0 : i32
    %2 = arith.cmpi ne, %1, %c0_i32_0 : i32
    scf.if %2 {
      %c0_8 = arith.constant 0 : index
      %c0_9 = arith.constant 0 : index
      %10 = vector.load %arg2[%c0_8, %c0_9] : memref<8x32xf32, #tpu.memory_space<vmem>>, vector<8x32xf32>
      %c0_10 = arith.constant 0 : index
      %c0_11 = arith.constant 0 : index
      %11 = vector.load %arg3[%c0_10, %c0_11] : memref<32x32xf32, #tpu.memory_space<vmem>>, vector<32x32xf32>
      %cst_12 = arith.constant dense<0.000000e+00> : vector<8x32xf32>
      %12 = tpu.matmul %10, %11, %cst_12 {dimension_numbers = #tpu.dot_dimension_numbers<[1], [0], [0], [1], [0, 0, 1, 1], [], []>} : vector<8x32xf32>, vector<32x32xf32>, vector<8x32xf32> -> vector<8x32xf32>
      %c0_13 = arith.constant 0 : index
      %c0_14 = arith.constant 0 : index
      %13 = vector.load %arg4[%c0_13, %c0_14] : memref<1x32xf32, #tpu.memory_space<vmem>>, vector<1x32xf32>
      %14 = vector.broadcast %13 : vector<1x32xf32> to vector<8x32xf32>
      %15 = arith.addf %12, %14 : vector<8x32xf32>
      %cst_15 = arith.constant 5.000000e-01 : f32
      %16 = vector.broadcast %cst_15 : f32 to vector<8x32xf32>
      %17 = arith.mulf %16, %15 : vector<8x32xf32>
      %cst_16 = arith.constant 0.707106769 : f32
      %18 = vector.broadcast %cst_16 : f32 to vector<8x32xf32>
      %19 = arith.mulf %15, %18 : vector<8x32xf32>
      %20 = math.absf %19 : vector<8x32xf32>
      %cst_17 = arith.constant 0.327591091 : f32
      %21 = vector.broadcast %cst_17 : f32 to vector<8x32xf32>
      %22 = arith.mulf %21, %20 : vector<8x32xf32>
      %cst_18 = arith.constant 1.000000e+00 : f32
      %23 = vector.broadcast %cst_18 : f32 to vector<8x32xf32>
      %24 = arith.addf %23, %22 : vector<8x32xf32>
      %cst_19 = arith.constant 1.000000e+00 : f32
      %25 = vector.broadcast %cst_19 : f32 to vector<8x32xf32>
      %26 = arith.divf %25, %24 : vector<8x32xf32>
      %cst_20 = arith.constant 1.06140542 : f32
      %27 = vector.broadcast %cst_20 : f32 to vector<8x32xf32>
      %28 = arith.mulf %27, %26 : vector<8x32xf32>
      %cst_21 = arith.constant -1.45315206 : f32
      %29 = vector.broadcast %cst_21 : f32 to vector<8x32xf32>
      %30 = arith.addf %28, %29 : vector<8x32xf32>
      %31 = arith.mulf %30, %26 : vector<8x32xf32>
      %cst_22 = arith.constant 1.42141378 : f32
      %32 = vector.broadcast %cst_22 : f32 to vector<8x32xf32>
      %33 = arith.addf %31, %32 : vector<8x32xf32>
      %34 = arith.mulf %33, %26 : vector<8x32xf32>
      %cst_23 = arith.constant -0.284496725 : f32
      %35 = vector.broadcast %cst_23 : f32 to vector<8x32xf32>
      %36 = arith.addf %34, %35 : vector<8x32xf32>
      %37 = arith.mulf %36, %26 : vector<8x32xf32>
      %cst_24 = arith.constant 0.254829586 : f32
      %38 = vector.broadcast %cst_24 : f32 to vector<8x32xf32>
      %39 = arith.addf %37, %38 : vector<8x32xf32>
      %40 = arith.mulf %39, %26 : vector<8x32xf32>
      %cst_25 = arith.constant 0.000000e+00 : f32
      %41 = vector.broadcast %cst_25 : f32 to vector<8x32xf32>
      %42 = arith.subf %41, %20 : vector<8x32xf32>
      %43 = arith.mulf %42, %20 : vector<8x32xf32>
      %44 = math.exp %43 : vector<8x32xf32>
      %45 = arith.mulf %40, %44 : vector<8x32xf32>
      %cst_26 = arith.constant 1.000000e+00 : f32
      %46 = vector.broadcast %cst_26 : f32 to vector<8x32xf32>
      %47 = arith.subf %46, %45 : vector<8x32xf32>
      %cst_27 = arith.constant 0.000000e+00 : f32
      %48 = vector.broadcast %cst_27 : f32 to vector<8x32xf32>
      %49 = arith.cmpf oge, %19, %48 : vector<8x32xf32>
      %cst_28 = arith.constant 0.000000e+00 : f32
      %50 = vector.broadcast %cst_28 : f32 to vector<8x32xf32>
      %51 = arith.subf %50, %47 : vector<8x32xf32>
      %52 = arith.select %49, %47, %51 : vector<8x32xi1>, vector<8x32xf32>
      %cst_29 = arith.constant 1.000000e+00 : f32
      %53 = vector.broadcast %cst_29 : f32 to vector<8x32xf32>
      %54 = arith.addf %53, %52 : vector<8x32xf32>
      %55 = arith.mulf %17, %54 : vector<8x32xf32>
      %cst_30 = arith.constant dense<0.000000e+00> : vector<8xf32>
      %56 = vector.multi_reduction <add>, %55, %cst_30 [1] : vector<8x32xf32> to vector<8xf32>
      %57 = vector.shape_cast %56 : vector<8xf32> to vector<8x1xf32>
      %cst_31 = arith.constant 3.200000e+01 : f32
      %58 = vector.broadcast %cst_31 : f32 to vector<8x1xf32>
      %59 = arith.divf %57, %58 : vector<8x1xf32>
      %60 = vector.broadcast %59 : vector<8x1xf32> to vector<8x32xf32>
      %61 = arith.subf %55, %60 : vector<8x32xf32>
      %62 = arith.mulf %61, %61 : vector<8x32xf32>
      %cst_32 = arith.constant dense<0.000000e+00> : vector<8xf32>
      %63 = vector.multi_reduction <add>, %62, %cst_32 [1] : vector<8x32xf32> to vector<8xf32>
      %64 = vector.shape_cast %63 : vector<8xf32> to vector<8x1xf32>
      %cst_33 = arith.constant 3.200000e+01 : f32
      %65 = vector.broadcast %cst_33 : f32 to vector<8x1xf32>
      %66 = arith.divf %64, %65 : vector<8x1xf32>
      %67 = vector.broadcast %59 : vector<8x1xf32> to vector<8x32xf32>
      %68 = arith.subf %55, %67 : vector<8x32xf32>
      %cst_34 = arith.constant 9.99999996E-13 : f32
      %69 = vector.broadcast %cst_34 : f32 to vector<8x1xf32>
      %70 = arith.addf %66, %69 : vector<8x1xf32>
      %71 = math.rsqrt %70 : vector<8x1xf32>
      %72 = vector.broadcast %71 : vector<8x1xf32> to vector<8x32xf32>
      %73 = arith.mulf %68, %72 : vector<8x32xf32>
      %c0_35 = arith.constant 0 : index
      %c0_36 = arith.constant 0 : index
      %74 = vector.load %arg5[%c0_35, %c0_36] : memref<1x32xf32, #tpu.memory_space<vmem>>, vector<1x32xf32>
      %75 = vector.broadcast %74 : vector<1x32xf32> to vector<8x32xf32>
      %76 = arith.mulf %73, %75 : vector<8x32xf32>
      %c0_37 = arith.constant 0 : index
      %c0_38 = arith.constant 0 : index
      %77 = vector.load %arg6[%c0_37, %c0_38] : memref<1x32xf32, #tpu.memory_space<vmem>>, vector<1x32xf32>
      %78 = vector.broadcast %77 : vector<1x32xf32> to vector<8x32xf32>
      %79 = arith.addf %76, %78 : vector<8x32xf32>
      %c0_39 = arith.constant 0 : index
      %c0_40 = arith.constant 0 : index
      %80 = vector.load %arg10[%c0_39, %c0_40] : memref<8x32xf32, #tpu.memory_space<vmem>>, vector<8x32xf32>
      tpu.vector_store %arg10[%c0_39, %c0_40], %79 {strides = array<i32>} : memref<8x32xf32, #tpu.memory_space<vmem>>, vector<8x32xf32>,
    } else {
    }
    %c0 = arith.constant 0 : index
    %c0_1 = arith.constant 0 : index
    %3 = vector.load %arg10[%c0, %c0_1] : memref<8x32xf32, #tpu.memory_space<vmem>>, vector<8x32xf32>
    %c0_2 = arith.constant 0 : index
    %c0_3 = arith.constant 0 : index
    %4 = vector.load %arg7[%c0_2, %c0_3] : memref<32x128xf32, #tpu.memory_space<vmem>>, vector<32x128xf32>
    %cst = arith.constant dense<0.000000e+00> : vector<8x128xf32>
    %5 = tpu.matmul %3, %4, %cst {dimension_numbers = #tpu.dot_dimension_numbers<[1], [0], [0], [1], [0, 0, 1, 1], [], []>} : vector<8x32xf32>, vector<32x128xf32>, vector<8x128xf32> -> vector<8x128xf32>
    %c0_4 = arith.constant 0 : index
    %c0_5 = arith.constant 0 : index
    %6 = vector.load %arg8[%c0_4, %c0_5] : memref<1x128xf32, #tpu.memory_space<vmem>>, vector<1x128xf32>
    %7 = vector.broadcast %6 : vector<1x128xf32> to vector<8x128xf32>
    %8 = arith.addf %5, %7 : vector<8x128xf32>
    %c0_6 = arith.constant 0 : index
    %c0_7 = arith.constant 0 : index
    %9 = vector.load %arg9[%c0_6, %c0_7] : memref<8x128xf32, #tpu.memory_space<vmem>>, vector<8x128xf32>
    tpu.vector_store %arg9[%c0_6, %c0_7], %8 {strides = array<i32>} : memref<8x128xf32, #tpu.memory_space<vmem>>, vector<8x128xf32>,
    return
  }
  func.func @transform_0(%arg0: i32, %arg1: i32) -> (i32, i32) {
    %c0_i32 = arith.constant 0 : i32
    %c0_i32_0 = arith.constant 0 : i32
    return %arg0, %c0_i32 : i32, i32
  }
  func.func @transform_1(%arg0: i32, %arg1: i32) -> (i32, i32) {
    %c0_i32 = arith.constant 0 : i32
    %c0_i32_0 = arith.constant 0 : i32
    %c0_i32_1 = arith.constant 0 : i32
    return %c0_i32, %c0_i32_0 : i32, i32
  }
  func.func @transform_2(%arg0: i32, %arg1: i32) -> (i32, i32) {
    %c0_i32 = arith.constant 0 : i32
    %c0_i32_0 = arith.constant 0 : i32
    %c0_i32_1 = arith.constant 0 : i32
    return %c0_i32, %c0_i32_0 : i32, i32
  }
  func.func @transform_3(%arg0: i32, %arg1: i32) -> (i32, i32) {
    %c0_i32 = arith.constant 0 : i32
    %c0_i32_0 = arith.constant 0 : i32
    %c0_i32_1 = arith.constant 0 : i32
    return %c0_i32, %c0_i32_0 : i32, i32
  }
  func.func @transform_4(%arg0: i32, %arg1: i32) -> (i32, i32) {
    %c0_i32 = arith.constant 0 : i32
    %c0_i32_0 = arith.constant 0 : i32
    %c0_i32_1 = arith.constant 0 : i32
    return %c0_i32, %c0_i32_0 : i32, i32
  }
  func.func @transform_5(%arg0: i32, %arg1: i32) -> (i32, i32) {
    %c0_i32 = arith.constant 0 : i32
    %c0_i32_0 = arith.constant 0 : i32
    return %c0_i32, %arg1 : i32, i32
  }
  func.func @transform_6(%arg0: i32, %arg1: i32) -> (i32, i32) {
    %c0_i32 = arith.constant 0 : i32
    %c0_i32_0 = arith.constant 0 : i32
    return %c0_i32, %arg1 : i32, i32
  }
  func.func @transform_7(%arg0: i32, %arg1: i32) -> (i32, i32) {
    %c0_i32 = arith.constant 0 : i32
    return %arg0, %arg1 : i32, i32
  }
}

</mosaic_0001>

<bundles_post_ra>
// kernel: tpu_custom_call.1
= control target key start
LH: loop header
LB: loop body
LE: loop exit
PB: predicated region body
PF: predicated region fallthrough
CT: control target
= control target key end

     0   :  { %s1697_s0 = inlined_call_operand.hbm [shape: f32[16,32], index: 0, kind: input, shape index: {}]   ;;  %s1698_s1 = inlined_call_operand.hbm [shape: f32[32,32], index: 1, kind: input, shape index: {}]   ;;  %s1699_s2 = inlined_call_operand.vmem [shape: f32[1,32], index: 2, kind: input, shape index: {}]   ;;  %s1700_s3 = inlined_call_operand.vmem [shape: f32[1,32], index: 3, kind: input, shape index: {}]   ;;  %s1701_s4 = inlined_call_operand.vmem [shape: f32[1,32], index: 4, kind: input, shape index: {}]   ;;  %s1702_s5 = inlined_call_operand.hbm [shape: f32[32,384], index: 5, kind: input, shape index: {}]   ;;  %s1703_s6 = inlined_call_operand.vmem [shape: f32[1,384], index: 6, kind: input, shape index: {}]   ;;  %s1704_s7 = inlined_call_operand.hbm [shape: f32[16,384], index: 7, kind: output, shape index: {}]  }
   0x1   :  { %1720 = sst [smem:[#allocation26_spill]] %s1697_s0 }
   0x2   :  { %1721 = sst [smem:[#allocation27_spill]] %s1699_s2 }
   0x3   :  { %1722 = sst [smem:[#allocation28_spill]] %s1700_s3 }
   0x4   :  { %1723 = sst [smem:[#allocation29_spill]] %s1701_s4 }
   0x5   :  { %1724 = sst [smem:[#allocation30_spill]] %s1703_s6 }
   0x6   :  { %1725 = sst [smem:[#allocation31_spill]] %s1704_s7 }
   0x7   :  { %12 = vsyncpa [#allocation4], 0 }
   0x8   :  { %14 = vsyncpa [#allocation4 + $0x1], 0 }
   0x9   :  { %15 = vsyncpa [#allocation7], 0 }
   0xa   :  { %16 = vsyncpa [#allocation5], 0 }
   0xb   :  { %18 = vsyncpa [#allocation5 + $0x1], 0  ;;  %s1270_s24 = smov 0   ;;  %s1272_s25 = smov 0  }
   0xc   :  { %s1274_s26 = smov 0   ;;  %s1276_s27 = smov 0  }
   0xd   :  { %s1278_s28 = smov 0   ;;  %s1280_s29 = smov 0  }
   0xe   :  { %s1282_s30 = smov 0   ;;  %s1284_s8 = smov 0  }
   0xf   :  { %s1286_s9 = smov 0   ;;  %s1288_s10 = smov 0  }
  0x10   :  { %s1290_s11 = smov 0   ;;  %s1292_s12 = smov 0  }
  0x11   :  { %s1294_s13 = smov 0   ;;  %s1296_s14 = smov 0  }
  0x12 LB: > { %1726 = sst [smem:[#allocation14_spill]] %s1171_s26  ;;  %s33_s15 = sadd.s32 1, %s1207_s12  ;;  %s1215_s14 = sphi %s1296_s14, %s24_s14   ;;  %s1211_s13 = sphi %s1294_s13, %s1779_s13   ;;  %s1207_s12 = sphi %s1292_s12, %s1778_s12   ;;  %s1203_s11 = sphi %s1290_s11, %s1777_s11   ;;  %s1199_s10 = sphi %s1288_s10, %s1776_s10   ;;  %s1195_s9 = sphi %s1286_s9, %s1775_s9   ;;  %s1191_s8 = sphi %s1284_s8, %s1785_s8   ;;  %s1187_s30 = sphi %s1282_s30, %s1784_s30   ;;  %s1183_s29 = sphi %s1280_s29, %s1773_s29   ;;  %s1179_s28 = sphi %s1278_s28, %s1783_s28   ;;  %s1175_s27 = sphi %s1276_s27, %s1782_s27   ;;  %s1171_s26 = sphi %s1274_s26, %s1771_s26   ;;  %s1167_s25 = sphi %s1272_s25, %s1781_s25   ;;  %s1163_s24 = sphi %s1270_s24, %s1780_s24  }
  0x13   : > { %1727 = sst [smem:[#allocation15_spill]] %s1183_s29  ;;  %s36_s16 = sadd.s32 1, %s1211_s13 }
  0x14   : > { %1728 = sst [smem:[#allocation16_spill]] %s1195_s9  ;;  %p34_p0 = scmp.ge.s32.totalorder %s33_s15, 3 }
  0x15   : > { %1729 = sst [smem:[#allocation17_spill]] %s1199_s10  ;;  %s43_s17 = sadd.s32 1, %s1195_s9 }
  0x16   : > { %1730 = sst [smem:[#allocation18_spill]] %s1203_s11  ;;  %p50_p1 = scmp.ne.s32.totalorder %s1195_s9, %s1191_s8 }
  0x17   : > { %1731 = sst [smem:[#allocation19_spill]] %s1207_s12  ;;  %p51_p2 = scmp.eq.s32.totalorder %s1215_s14, 0 }
  0x18   : > { %1732 = sst [smem:[#allocation20_spill]] %s1211_s13  ;;  %s1787_s15 = smov (%p34_p0, %s33_s15), 0 }
  0x19   : > { %1733 = sst [smem:[#allocation21_spill]] %s1787_s15  ;;  %s1789_s16 = smov (!%p34_p0, %s36_s16), %s1211_s13 }
  0x1a   : > { %p1351_p3 = por %p51_p2, %p50_p1  ;;  %p38_p5 = scmp.ge.s32.totalorder %s1789_s16, 2 }
  0x1b   : > { %s150_s19 = ssub.s32 %s1207_s12, %s1787_s15  ;;  %s153_s20 = sadd.s32 1, %s1183_s29 }
  0x1c   : > { %p151_p6 = scmp.eq.s32.totalorder %s150_s19, 0  ;;  %s1791_s16 = smov (%p38_p5, %s1789_s16), 0 }
  0x1d   : > { %1735 = sst [smem:[#allocation22_spill]] %s1791_s16  ;;  %s40_s22 = ssub.s32 %s1211_s13, %s1791_s16 }
  0x1e   : > { %s1363_s21 = scalar_select %p151_p6, %s1183_s29, %s153_s20  }
  0x1f   : > { %p160_p7 = scmp.ne.s32.totalorder %s1183_s29, %s1179_s28  ;;  %p41_p8 = scmp.eq.s32.totalorder %s40_s22, 0 }
  0x20   : > { %1736 = sst [smem:[#allocation23_spill]] %s1363_s21  ;;  %s204_s15 = sor.u32 %s150_s19, %s40_s22 }
  0x21   : > { %p1373_p10 = por %p160_p7, %p51_p2  ;;  %p205_p11 = scmp.eq.s32.totalorder %s204_s15, 0 }
  0x22   : > { %s1378_s7 = scalar_select %p41_p8, %s1195_s9, %s43_s17  }
  0x23   : > { %s207_s11 = sadd.s32 1, %s1171_s26  ;;  %p842_p12 = scmp.lt.s32.totalorder %s1215_s14, 6 }
  0x24   : > { %1738 = sst [smem:[#allocation24_spill]] %s1378_s7  ;;  %s266_s20 = sand.u32 1, %s1215_s14  }
  0x25   : > { %s1383_s4 = scalar_select %p205_p11, %s1171_s26, %s207_s11  }
  0x26   : > { %s268_s16 = sand.u32 1, %s1195_s9   ;;  %s752_s3 = sshll.u32 %s1211_s13, 7 }
  0x27   : > { %1739 = sst [smem:[#allocation25_spill]] %s1383_s4  ;;  %s751_s21 = sshll.u32 %s268_s16, 3 }
  0x28   : > { %s1740_s0 = sld [smem:[#allocation26_spill]]  ;;  %s270_s17 = scalar_lea.vmem [#allocation3], %s751_s21 }
  0x29   : > { %s277_s19 = sshll.u32 %s270_s17, 4  ;;  %p1397_p13 = pnand %p842_p12, %p1351_p3  ;;  %s1393_s19 = int_to_ptr.vmem [resolvable:$true] %s277_s19 }
  0x2a   : > { %p1403_p0 = pnand %p842_p12, %p1373_p10 }
  0x2b   : > { %p975_p2 = pneg %p1397_p13 }
  0x2c   : > { %s1742_s2 = scalar_select %p1403_p0, 1, 0 }
  0x2e   : > { %s1391_s10 = scalar_lea.hbm %s1740_s0, %s752_s3  ;;  %s1407_s3 = scalar_lea.sflag [#allocation4], %s266_s20 }
  0x2f   : > { %s973_s6 = scalar_lea.hbm %s1391_s10, 128  ;;  %s978_s18 = scalar_lea.hbm %s1740_s0, 256 }
  0x30   : > { %p974_p1 = scmp.ne.s32.totalorder %s1391_s10, %s973_s6  ;;  %p979_p6 = scmp.lt.u32.totalorder %s1391_s10, %s1740_s0 }
  0x31   : > { %p980_p7 = scmp.lt.u32.totalorder %s978_s18, %s973_s6  ;;  %p982_p10 = scmp.lt.u32.totalorder %s973_s6, %s1391_s10 }
  0x32   : > { %p976_p5 = pnand %p975_p2, %p974_p1 }
  0x33   : > { %p981_p8 = por %p980_p7, %p979_p6 }
  0x34   : > { %p977_p3 = pneg %p976_p5 }
  0x35   : > { %p983_p11 = por %p982_p10, %p981_p8 }
  0x37   : > { %p984_p12 = pnand %p983_p11, %p977_p3 }
  0x39   : > { %987 = shalt.err (!%p984_p12)
}
  0x3a   : > { %s988_s23 = scalar_lea.vmem %s1393_s19, 128  ;;  %s1217_s20 = smov [#allocation3]  }
  0x3b   : > { %p989_p1 = scmp.ne.s32.totalorder %s1393_s19, %s988_s23  ;;  %s993_s17 = sshll.u32 %s1217_s20, 4  ;;  %s994_s17 = int_to_ptr.vmem [resolvable:$false] %s993_s17 }
  0x3c   : > { %s995_s15 = scalar_lea.vmem %s994_s17, 256  ;;  %p996_p4 = scmp.lt.s32.totalorder %s1393_s19, %s994_s17 }
  0x3d   : > { %p991_p5 = pnand %p989_p1, %p975_p2  ;;  %p997_p6 = scmp.lt.s32.totalorder %s995_s15, %s988_s23 }
  0x3f   : > { %p992_p9 = pneg %p991_p5  ;;  %p998_p7 = por %p997_p6, %p996_p4 }
  0x41   : > { %p999_p8 = pnand %p998_p7, %p992_p9 }
  0x43   : > { %1002 = shalt.err (!%p999_p8)
}
  0x44   : > { %833 = dma.hbm_to_vmem [thread:$0]  (!%p1397_p13), %s1391_s10, 128, %s1393_s19, %s1407_s3  }
  0x45   : > { %s1436_s6 = sadd.s32 4294967295, %s1215_s14   ;;  %s747_s11 = sadd.s32 4294967294, %s1215_s14  }
  0x46   : > { %p1714_p4 = scmp.eq.s32.totalorder %s1436_s6, 0  ;;  %p217_p9 = scmp.ne.s32.totalorder %s1171_s26, %s1167_s25 }
  0x47   : > { %p218_p2 = scmp.eq.s32.totalorder %s1436_s6, 5  ;;  %p1743_p3 = scmp.ne.s32.totalorder %s1191_s8, %s1187_s30 }
  0x48   : > { %p1745_p13 = scmp.ne.s32.totalorder %s1179_s28, %s1175_s27  ;;  %p223_p1 = scmp.ne.s32.totalorder %s1167_s25, %s1163_s24 }
  0x49   : > { %p1448_p10 = por %p1714_p4, %p1743_p3  ;;  %p1461_p12 = por %p218_p2, %p217_p9 }
  0x4a   : > { %p1457_p11 = por %p1745_p13, %p1714_p4  ;;  %p224_p5 = scmp.eq.s32.totalorder %s747_s11, 5 }
  0x4b   : > { %s1744_s16 = scalar_select %p1448_p10, 1, 0 }
  0x4c   : > { %s1746_s10 = scalar_select %p1457_p11, 1, 0 }
  0x4d   : > { %s1747_s19 = scalar_select %p1461_p12, 1, 0 }
  0x4e   : > { %p748_p6 = scmp.ge.s32.totalorder %s1215_s14, 1  ;;  %p231_p7 = scmp.lt.s32.totalorder %s1215_s14, 7 }
  0x4f   : > { %p1469_p8 = por %p224_p5, %p223_p1  ;;  %s1218_s27 = smov [#allocation6]  }
  0x50   : > { %p1473_p3 = pnand %p748_p6, %p231_p7  ;;  %s243_s21 = sshll.u32 %s1218_s27, 4  ;;  %s1477_s21 = int_to_ptr.vmem [resolvable:$true] %s243_s21 }
  0x51   : > { %s1748_s30 = scalar_select %p1469_p8, 1, 0 }
  0x52   : > { %s1749_s18 = scalar_select %p1473_p3, 1, 0 }
  0x53   : > { %p826_p9 = pneg %p1473_p3  ;;  %s286_s22 = sand.u32 1, %s1183_s29  }
  0x54   : > { %s754_s23 = sshll.u32 %s1207_s12, 7  ;;  %s753_s17 = sshll.u32 %s286_s22, 5 }
  0x55   : > { %p1485_p2 = pnand %p826_p9, %p1714_p4  ;;  %s1492_s0 = scalar_lea.hbm %s1702_s5, %s754_s23 }
  0x56   : > { %s288_s13 = scalar_lea.vmem [#allocation8], %s753_s17  ;;  %s1003_s4 = scalar_lea.hbm %s1698_s1, 512 }
  0x57   : > { %s294_s27 = sshll.u32 %s288_s13, 4  ;;  %p1004_p13 = scmp.ne.s32.totalorder %s1698_s1, %s1003_s4  ;;  %s1518_s27 = int_to_ptr.vmem [resolvable:$true] %s294_s27 }
  0x58   : > { %p1005_p1 = pneg %p1485_p2  ;;  %p1010_p7 = scmp.lt.u32.totalorder %s1003_s4, %s1698_s1 }
  0x5a   : > { %p1006_p5 = pnand %p1005_p1, %p1004_p13 }
  0x5c   : > { %p1007_p6 = pneg %p1006_p5 }
  0x5e   : > { %p1012_p9 = pnand %p1010_p7, %p1007_p6 }
  0x60   : > { %1015 = shalt.err (!%p1012_p9)
}
  0x61   : > { %s1016_s13 = scalar_lea.vmem %s1477_s21, 512  ;;  %p1024_p11 = scmp.lt.s32.totalorder %s1477_s21, %s1477_s21 }
  0x62   : > { %p1017_p4 = scmp.ne.s32.totalorder %s1477_s21, %s1016_s13  ;;  %p1025_p10 = scmp.lt.s32.totalorder %s1016_s13, %s1016_s13 }
  0x64   : > { %p1019_p8 = pnand %p1017_p4, %p1005_p1  ;;  %p1026_p3 = por %p1025_p10, %p1024_p11 }
  0x66   : > { %p1020_p12 = pneg %p1019_p8 }
  0x68   : > { %p1027_p0 = pnand %p1026_p3, %p1020_p12 }
  0x6a   : > { %1030 = shalt.err (!%p1027_p0)
}
  0x6b   : > { %s1219_s7 = smov 128   ;;  %s1220_s4 = smov 8  }
  0x6c   : > { %829 = dma.hbm_to_vmem [thread:$0]  (!%p1485_p2), %s1698_s1, 512, %s1477_s21, [#allocation7], %s1219_s7, %s1219_s7, %s1220_s4  }
  0x6d   : > { %s1031_s9 = scalar_lea.hbm %s1492_s0, 512  ;;  %p1751_p4 = scmp.ne.s32.totalorder %s1742_s2, 0 }
  0x6e   : > { %p1032_p0 = scmp.ne.s32.totalorder %s1492_s0, %s1031_s9  ;;  %s1036_s20 = scalar_lea.hbm %s1702_s5, 1536 }
  0x6f   : > { %p1033_p10 = pneg %p1751_p4  ;;  %p1037_p8 = scmp.lt.u32.totalorder %s1492_s0, %s1702_s5 }
  0x70   : > { %p1038_p3 = scmp.lt.u32.totalorder %s1036_s20, %s1031_s9  ;;  %p1040_p13 = scmp.lt.u32.totalorder %s1031_s9, %s1492_s0 }
  0x71   : > { %p1034_p11 = pnand %p1033_p10, %p1032_p0 }
  0x72   : > { %p1039_p2 = por %p1038_p3, %p1037_p8 }
  0x73   : > { %p1035_p12 = pneg %p1034_p11 }
  0x74   : > { %p1041_p1 = por %p1040_p13, %p1039_p2 }
  0x76   : > { %p1042_p5 = pnand %p1041_p1, %p1035_p12 }
  0x78   : > { %1045 = shalt.err (!%p1042_p5)
}
  0x79   : > { %s1046_s21 = scalar_lea.vmem %s1518_s27, 512  ;;  %s1221_s11 = smov [#allocation8]  }
  0x7a   : > { %p1047_p6 = scmp.ne.s32.totalorder %s1518_s27, %s1046_s21  ;;  %s1051_s22 = sshll.u32 %s1221_s11, 4  ;;  %s1052_s22 = int_to_ptr.vmem [resolvable:$false] %s1051_s22 }
  0x7b   : > { %s1053_s13 = scalar_lea.vmem %s1052_s22, 1024  ;;  %p1054_p0 = scmp.lt.s32.totalorder %s1518_s27, %s1052_s22 }
  0x7c   : > { %p1049_p7 = pnand %p1047_p6, %p1033_p10  ;;  %p1055_p11 = scmp.lt.s32.totalorder %s1053_s13, %s1046_s21 }
  0x7e   : > { %p1050_p9 = pneg %p1049_p7  ;;  %p1056_p8 = por %p1055_p11, %p1054_p0 }
  0x80   : > { %p1057_p3 = pnand %p1056_p8, %p1050_p9 }
  0x82   : > { %1060 = shalt.err (!%p1057_p3)
}
  0x83   : > { %s1222_s26 = smov 384   ;;  %p1752_p10 = scmp.ne.s32.totalorder %s1749_s18, 0 }
  0x84   : > { %836 = dma.hbm_to_vmem [thread:$0]  (!%p1751_p4), %s1492_s0, 512, %s1518_s27, %s1407_s3, %s1222_s26, %s1219_s7, %s1220_s4  }
  0x85   : > { %312 = sbr.rel (%p1752_p10) target bundleno = 980 (0x3d4), region = 48  ;;  %s314_s29 = sand.u32 (!%p1752_p10), 1, %s1436_s6  }
  0x86   : > { %s316_s9 = sand.u32 (!%p1752_p10), 1, %s1191_s8   ;;  %s315_s23 = scalar_lea.sflag (!%p1752_p10), [#allocation4], %s314_s29 }
  0x87   : > { %s1552_s12 = sshll.u32 (!%p1752_p10), %s316_s9, 3  ;;  %p1753_p12 = scmp.ne.s32.totalorder (!%p1752_p10), %s1744_s16, 0 }
  0x88   : > { %s318_s20 = scalar_lea.vmem (!%p1752_p10), [#allocation3], %s1552_s12 }
  0x8c   : > { %1146 = dma.done.wait (%p1753_p12), %s315_s23, 128  }
  0x8d   : > { %1148 = vsyncadd (%p1753_p12), %s315_s23, 4294967168  ;;  %p1754_p4 = scmp.eq.s32.totalorder %s1436_s6, 0 }
  0x8f   : > { %1150 = dma.done.wait (%p1754_p4), [#allocation7], 512   ;;  %p1755_p2 = pmov %p1754_p4 }
  0x90   : > { %s329_s0 = sand.u32 1, %s1179_s28   ;;  %p1756_p13 = scmp.ne.s32.totalorder %s1746_s10, 0 }
  0x91   : > { %1152 = vsyncadd (%p1755_p2), [#allocation7], 4294966784  ;;  %s758_s2 = sshll.u32 %s329_s0, 5 }
  0x92   : > { %s1564_s3 = scalar_lea.vmem [#allocation8], %s758_s2 }
  0x93   : > { %1154 = dma.done.wait (%p1756_p13), %s315_s23, 512  }
  0x94   : > { %1156 = vsyncadd (%p1756_p13), %s315_s23, 4294966784  ;;  %s1757_s16 = sld [smem:[#allocation17_spill]]  ;;  %s367_s18 = sand.u32 1, %s1167_s25  }
  0x95   : > { %s1574_s6 = sshll.u32 %s367_s18, 3  ;;  %s1758_s17 = sld [smem:[#allocation30_spill]] }
  0x96   : > { %s369_s21 = scalar_lea.vmem [#allocation9], %s1574_s6 }
  0x9a   : > { %p370_p1 = scmp.lt.s32.totalorder %s1757_s16, 2  ;;  %p760_p5 = scmp.ne.s32.totalorder %s1757_s16, 0 }
  0x9b   : > { %v378_v0 = vld [vmem:[#allocation6] sm:$0xff] (!%p760_p5)  ;;  %v379_v1 = vld [vmem:[#allocation6 + $0x8] sm:$0xff] (!%p760_p5)  ;;  %v380_v2 = vld [vmem:[#allocation6 + $0x10] sm:$0xff] (!%p760_p5)  ;;  %v1223_v3 = vmov (!%p760_p5), 0.0|0.0   ;;  %vm1224_vm0 = vmmov (!%p760_p5), 0   ;;  %v1225_v6 = vmov (!%p760_p5), 0.0  }
  0x9c   : > { %s1577_s27 = scalar_select %p370_p1, %s1757_s16, 2 }
  0x9d   : > { %376 = sbr.rel (%p760_p5) target bundleno = 742 (0x2e6), region = 64  ;;  %803 = vmatprep.subr.bf16.mxu0 (!%p760_p5), %v1223_v3  ;;  %v804_v4 = vpack.c.bf16 (!%p760_p5), %v379_v1, %v378_v0  ;;  %v381_v5 = vld [vmem:[#allocation6 + $0x18] sm:$0xff] (!%p760_p5)  ;;  %789 = vmatprep.mubr.msk.f32.mxu0 (!%p760_p5), %vm1224_vm0, %v1225_v6  ;;  %vm389_vm1 = vcmask (!%p760_p5), 261120   ;;  %s1759_s22 = sld [smem:[#allocation27_spill]] (!%p760_p5) }
  0x9e   : > { %s372_s15 = scalar_lea.vmem %s1758_s17, %s1577_s27  ;;  %v807_v7 = vpack.c.bf16 (!%p760_p5), %v381_v5, %v380_v2  ;;  %v377_v8 = vld [vmem:[%s318_s20] sm:$0xff] (!%p760_p5)  ;;  %s1760_s29 = sld [smem:[#allocation28_spill]] (!%p760_p5) }
  0x9f   : > { %805 = vmatpush3.bf16.msra.mxu0 (!%p760_p5), %v804_v4  ;;  %s1761_s23 = sld [smem:[#allocation29_spill]] (!%p760_p5) }
  0xa0   : > { %806 = vmatprep.subr.bf16.mxu0 (!%p760_p5), %v1223_v3 }
  0xa3   : > { %808 = vmatpush3.bf16.msra.mxu0 (!%p760_p5), %v807_v7  ;;  %v761_v9 = vld [vmem:[%s1759_s22] ss:$0 sm:$0xff] (!%p760_p5) }
  0xa4   : > { %v763_v48 = vld [vmem:[%s1760_s29] ss:$0 sm:$0xff] }
  0xa5   : > { %v764_v50 = vld [vmem:[%s1761_s23] ss:$0 sm:$0xff] }
  0xa6   : > { %790 = vmatmul.mubr.msk.f32.vlgmr.msra.gmra.mrb[0].mxu0 %vm389_vm1, %v377_v8 }
 0x179   : > { %v459_v10 = vpop.f32.mrb[0].mxu0 }
 0x17a   : > { %v460_v11 = vadd.f32 %v761_v9, %v459_v10  ;;  %v791_v12 = vpop.f32.mrb[1].mxu0 }
 0x17c   : > { %v464_v13 = vmul.f32 0.70710677, %v460_v11  ;;  %v463_v35 = vmul.f32 0.5, %v460_v11 }
 0x17e   : > { %v465_v14 = vand.u32 2147483647, %v464_v13  ;;  %vm485_vm2 = vcmp.ge.f32.partialorder %v464_v13, 0.0 }
 0x180   : > { %v466_v15 = vmul.f32 0.3275911, %v465_v14  ;;  %v479_v17 = vsub.f32 0.0, %v465_v14 }
 0x182   : > { %v467_v16 = vadd.f32 1.0, %v466_v15  ;;  %v480_v19 = vmul.f32 %v479_v17, %v465_v14 }
 0x184   : > { %967 = vrcp.f32 %v467_v16  ;;  %v481_v22 = vmul.f32 1.442695, %v480_v19 }
 0x186   : > { %969 = vpow2.f32 %v481_v22 }
 0x18e   : > { %v968_v18 = vpop.eup %967 }
 0x18f   : > { %v470_v20 = vmul.f32 1.0614054, %v968_v18 }
 0x190   : > { %v970_v30 = vpop.eup %969 }
 0x191   : > { %v471_v21 = vadd.f32 -1.4531521, %v470_v20 }
 0x193   : > { %v472_v23 = vmul.f32 %v968_v18, %v471_v21 }
 0x195   : > { %v473_v24 = vadd.f32 1.4214138, %v472_v23 }
 0x197   : > { %v474_v25 = vmul.f32 %v968_v18, %v473_v24 }
 0x199   : > { %v475_v26 = vadd.f32 -0.28449672, %v474_v25 }
 0x19b   : > { %v476_v27 = vmul.f32 %v968_v18, %v475_v26 }
 0x19d   : > { %v477_v28 = vadd.f32 0.2548296, %v476_v27 }
 0x19f   : > { %v478_v29 = vmul.f32 %v968_v18, %v477_v28 }
 0x1a1   : > { %v483_v31 = vmul.f32 %v970_v30, %v478_v29 }
 0x1a3   : > { %v484_v32 = vsub.f32 1.0, %v483_v31 }
 0x1a5   : > { %v486_v33 = vsub.f32 0.0, %v484_v32 }
 0x1a7   : > { %v487_v34 = vsel %vm485_vm2, %v484_v32, %v486_v33 }
 0x1a8   : > { %v488_v36 = vadd.f32 1.0, %v487_v34 }
 0x1aa   : > { %v489_v37 = vmul.f32 %v488_v36, %v463_v35 }
 0x1ac   : > { %v490_v38 = vsel %vm389_vm1, %v489_v37, 0.0 }
 0x1ad   : > { %491 = vadd.xlane.f32.xlu0 %v490_v38 }
 0x23a   : > { %v492_v39 = vpop.xlane.xlu0 %491 }
 0x23b   : > { %v494_v40 = vmul.f32 0.03125, %v492_v39 }
 0x23d   : > { %v495_v41 = vsub.f32 %v489_v37, %v494_v40 }
 0x23f   : > { %v496_v42 = vmul.f32 %v495_v41, %v495_v41 }
 0x241   : > { %v497_v43 = vsel %vm389_vm1, %v496_v42, 0.0 }
 0x242   : > { %498 = vadd.xlane.f32.xlu0 %v497_v43 }
 0x2cf   : > { %v499_v44 = vpop.xlane.xlu0 %498 }
 0x2d0   : > { %v500_v45 = vmul.f32 0.03125, %v499_v44 }
 0x2d2   : > { %v501_v46 = vadd.f32 1e-12, %v500_v45 }
 0x2d4   : > { %971 = vrsqrt.f32 %v501_v46 }
 0x2de   : > { %v972_v47 = vpop.eup %971 }
 0x2df   : > { %v503_v49 = vmul.f32 %v972_v47, %v495_v41 }
 0x2e1   : > { %v511_v51 = vmul.f32 %v763_v48, %v503_v49 }
 0x2e3   : > { %v519_v52 = vadd.f32 %v764_v50, %v511_v51 }
 0x2e5   : > { %520 = vst.msk [vmem:[#allocation2] sm:$0xff] %vm389_vm1, %v519_v52 }
 0x2e6 PF: > { %v522_v53 = vld [vmem:[%s1564_s3] sm:$0xff]  ;;  %v523_v54 = vld [vmem:[%s1564_s3 + $0x8] sm:$0xff]  ;;  %s1762_s20 = sld [smem:[#allocation18_spill]]  ;;  %v524_v55 = vld [vmem:[%s1564_s3 + $0x10] sm:$0xff]  ;;  %s1763_s0 = sld [smem:[#allocation17_spill]]  ;;  %v1226_v56 = vmov 0.0|0.0  }
 0x2e7   : > { %809 = vmatprep.subr.bf16.mxu0 %v1226_v56  ;;  %v810_v57 = vpack.c.bf16 %v523_v54, %v522_v53  ;;  %v525_v58 = vld [vmem:[%s1564_s3 + $0x18] sm:$0xff]  ;;  %vm1227_vm3 = vmmov 0   ;;  %v1228_v59 = vmov 0.0   ;;  %vm533_vm4 = vcmask 261120   ;;  %v765_v62 = vld [vmem:[%s372_s15] ss:$0 sm:$0xff] }
 0x2e8   : > { %800 = vmatprep.mubr.msk.f32.mxu0 %vm1227_vm3, %v1228_v59  ;;  %v813_v60 = vpack.c.bf16 %v525_v58, %v524_v55  ;;  %s624_s10 = sshll.u32 %s369_s21, 4  ;;  %s1765_s13 = sld [smem:[#allocation31_spill]]  ;;  %s1618_s10 = int_to_ptr.vmem [resolvable:$true] %s624_s10 }
 0x2e9   : > { %811 = vmatpush3.bf16.msra.mxu0 %v810_v57  ;;  %s609_s27 = scalar_lea.sflag [#allocation5], %s367_s18  ;;  %s1061_s15 = scalar_lea.vmem %s1618_s10, 128 }
 0x2ea   : > { %812 = vmatprep.subr.bf16.mxu0 %v1226_v56  ;;  %p1062_p6 = scmp.ne.s32.totalorder %s1618_s10, %s1061_s15  ;;  %p1767_p7 = scmp.ne.s32.totalorder %s1747_s19, 0 }
 0x2eb   : > { %s1229_s29 = smov [#allocation9]  }
 0x2ec   : > { %v521_v61 = vld [vmem:[#allocation2] sm:$0xff]  ;;  %s815_s2 = smul.u32 3, %s1762_s20  ;;  %p1063_p9 = pnand %p1062_p6, %p1767_p7 }
 0x2ed   : > { %814 = vmatpush3.bf16.msra.mxu0 %v813_v60  ;;  %s1065_s9 = sshll.u32 %s1229_s29, 4  ;;  %s1066_s9 = int_to_ptr.vmem [resolvable:$false] %s1065_s9 }
 0x2ee   : > { %s620_s16 = sadd.s32 %s1763_s0, %s815_s2  ;;  %s1766_s23 = smov %s1765_s13 }
 0x2ef   : > { %s768_s3 = sshll.u32 %s620_s16, 7  ;;  %p1064_p0 = pneg %p1063_p9 }
 0x2f0   : > { %801 = vmatmul.mubr.msk.f32.vlgmr.msra.gmra.mrb[0].mxu0 %vm533_vm4, %v521_v61  ;;  %s1616_s26 = scalar_lea.hbm %s1765_s13, %s768_s3  ;;  %s1067_s12 = scalar_lea.vmem %s1066_s9, 256 }
 0x2f1   : > { %p1068_p11 = scmp.lt.s32.totalorder %s1618_s10, %s1066_s9  ;;  %p1069_p8 = scmp.lt.s32.totalorder %s1067_s12, %s1061_s15 }
 0x2f3   : > { %p1070_p3 = por %p1069_p8, %p1068_p11 }
 0x2f5   : > { %p1071_p10 = pnand %p1070_p3, %p1064_p0 }
 0x3c3   : > { %v603_v63 = vpop.f32.mrb[0].mxu0 }
 0x3c4   : > { %v604_v0 = vadd.f32 %v765_v62, %v603_v63  ;;  %v802_v1 = vpop.f32.mrb[1].mxu0 }
 0x3c6   : > { %607 = vst [vmem:[%s369_s21] sm:$0xff] %v604_v0 }
 0x3c7   : > { %1074 = shalt.err (!%p1071_p10)
}
 0x3c8   : > { %s1075_s18 = scalar_lea.hbm %s1616_s26, 128  ;;  %s1079_s20 = scalar_lea.hbm %s1766_s23, 768 }
 0x3c9   : > { %p1076_p12 = scmp.ne.s32.totalorder %s1616_s26, %s1075_s18  ;;  %p1080_p13 = scmp.lt.u32.totalorder %s1616_s26, %s1766_s23 }
 0x3ca   : > { %p1081_p1 = scmp.lt.u32.totalorder %s1079_s20, %s1075_s18  ;;  %p1083_p6 = scmp.lt.u32.totalorder %s1075_s18, %s1616_s26 }
 0x3cb   : > { %p1077_p4 = pnand %p1076_p12, %p1767_p7 }
 0x3cc   : > { %p1082_p5 = por %p1081_p1, %p1080_p13 }
 0x3cd   : > { %p1078_p2 = pneg %p1077_p4 }
 0x3ce   : > { %p1084_p9 = por %p1083_p6, %p1082_p5 }
 0x3d0   : > { %p1085_p0 = pnand %p1084_p9, %p1078_p2 }
 0x3d2   : > { %1088 = shalt.err (!%p1085_p0)
}
 0x3d3   : > { %824 = dma.vmem_to_hbm [thread:$0]  (%p1767_p7), %s1618_s10, 128, %s1616_s26, %s609_s27  }
 0x3d4 PF: > { %p844_p11 = scmp.ge.s32.totalorder %s1215_s14, 2  ;;  %s636_s16 = sand.u32 1, %s1163_s24  }
 0x3d5   : > { %p1768_p8 = scmp.ne.s32.totalorder %s1748_s30, 0  ;;  %s637_s7 = scalar_lea.sflag [#allocation5], %s636_s16 }
 0x3d7   : > { %p838_p3 = pnand %p844_p11, %p1768_p8 }
 0x3d9   : > { %1158 = dma.done.wait (!%p838_p3), %s637_s7, 128  }
 0x3da   : > { %1160 = vsyncadd (!%p838_p3), %s637_s7, 4294967168  ;;  %s24_s14 = sadd.s32 1, %s1215_s14   ;;  %s1770_s19 = sld [smem:[#allocation14_spill]] }
 0x3db   : > { %p1650_p10 = scmp.ge.s32.totalorder %s24_s14, 8   ;;  %s1771_s26 = sld [smem:[#allocation25_spill]] }
 0x3dc   : > { %s1772_s17 = sld [smem:[#allocation15_spill]]  ;;  %s1773_s29 = sld [smem:[#allocation23_spill]] }
 0x3dd   : > { %s1774_s3 = sld [smem:[#allocation16_spill]]  ;;  %s1775_s9 = sld [smem:[#allocation24_spill]] }
 0x3de   : > { %s1776_s10 = sld [smem:[#allocation19_spill]]  ;;  %s1777_s11 = sld [smem:[#allocation20_spill]] }
 0x3df   : > { %s1778_s12 = sld [smem:[#allocation21_spill]]  ;;  %s1779_s13 = sld [smem:[#allocation22_spill]] }
 0x3e0   : > { %s1780_s24 = smov %s1167_s25  ;;  %s1781_s25 = smov %s1770_s19 }
 0x3e1   : > { %s1782_s27 = smov %s1179_s28  ;;  %s1784_s30 = smov %s1191_s8 }
 0x3e2   : > { %s1783_s28 = smov %s1772_s17  ;;  %23 = sbr.rel (!%p1650_p10) target bundleno = 18 (0x12), region = 115 }
 0x3e3   : > { %s1785_s8 = smov %s1774_s3 }
 0x3e9   :  { %642 = vsyncpa [#allocation4], 1 }
 0x3ea   :  { %644 = vsyncpa [#allocation4 + $0x1], 1 }
 0x3eb   :  { %645 = vsyncpa [#allocation7], 1 }
 0x3ec   :  { %646 = vsyncpa [#allocation5], 1 }
 0x3ed   :  { %648 = vsyncpa [#allocation5 + $0x1], 1 }

</bundles_post_ra>
